<compile_context>
chip_gen: v5e
topology: v5e:2x2
jax: 0.10.0
libtpu: 0.0.40
codegen_flags: <defaults>
</compile_context>

<pallas_src>
import functools

import jax
import jax.numpy as jnp
from jax.experimental import pallas as pl
from jax.experimental.pallas import tpu as pltpu


def _adain_kernel(x_ref, scale_ref, shift_ref, o_ref, *, eps, hw):
    # x_ref     : (ROWS, HW)  activations for ROWS instances
    # scale_ref : (ROWS, 1)   per-instance scale (already includes +1)
    # shift_ref : (ROWS, 1)   per-instance shift
    x = x_ref[...].astype(jnp.float32)

    # One-pass biased statistics over the spatial (lane) axis.
    inv_hw = 1.0 / hw
    s1 = jnp.sum(x, axis=-1, keepdims=True)          # (ROWS, 1)
    s2 = jnp.sum(x * x, axis=-1, keepdims=True)      # (ROWS, 1)
    mean = s1 * inv_hw
    var = s2 * inv_hw - mean * mean
    inv_std = jax.lax.rsqrt(var + eps)

    # Fold normalization + affine into one FMA pass.
    a = inv_std * scale_ref[...].astype(jnp.float32)           # (ROWS, 1)
    b = shift_ref[...].astype(jnp.float32) - mean * a          # (ROWS, 1)
    o_ref[...] = (x * a + b).astype(o_ref.dtype)


def adaptive_instance_norm2d(x, w, weight_proj_w, weight_proj_b,
                             bias_proj_w, bias_proj_b, eps=1e-5,
                             rows_per_block=None):
    """x: (B, C, H, W) NCHW; w: (B, num_w)."""
    B, C, H, W = x.shape
    HW = H * W
    N = B * C

    # --- Adaptive affine parameters, hoisted out of the kernel. ------------
    # Fuse both projections into a single matmul on the NW contraction axis
    # (no explicit transpose of the Linear weights needed).
    proj_w = jnp.concatenate([weight_proj_w, bias_proj_w], axis=0)        # (2C, NW)
    proj_b = jnp.concatenate([weight_proj_b + 1.0, bias_proj_b], axis=0)  # (2C,)
    params = jax.lax.dot_general(
        w.astype(jnp.float32), proj_w.astype(jnp.float32),
        dimension_numbers=(((1,), (1,)), ((), ())),
        preferred_element_type=jnp.float32,
    ) + proj_b                                                            # (B, 2C)
    scale = params[:, :C].reshape(N, 1)                                   # (B*C, 1)
    shift = params[:, C:].reshape(N, 1)                                   # (B*C, 1)

    # --- Row tiling over the instance axis. --------------------------------
    x_flat = x.reshape(N, HW)

    if rows_per_block is None:
        # Keep each input/output buffer around <=4 MiB so that double-buffered
        # inputs + outputs comfortably fit every generation's scoped VMEM
        # default (16 MiB v5e / 32 MiB v6e / v7x).
        bytes_per_row = HW * 4
        rows = (4 << 20) // max(bytes_per_row, 1)
        rows = max(8, min(512, (rows // 8) * 8))
    else:
        rows = max(8, (rows_per_block // 8) * 8)
    # Don't exceed the (padded) number of instances.
    rows = min(rows, max(8, ((N + 7) // 8) * 8))

    n_pad = pl.cdiv(N, rows) * rows
    if n_pad != N:
        pad = n_pad - N
        x_flat = jnp.pad(x_flat, ((0, pad), (0, 0)))
        scale = jnp.pad(scale, ((0, pad), (0, 0)))
        shift = jnp.pad(shift, ((0, pad), (0, 0)))

    grid = (n_pad // rows,)

    out_flat = pl.pallas_call(
        functools.partial(_adain_kernel, eps=eps, hw=float(HW)),
        out_shape=jax.ShapeDtypeStruct((n_pad, HW), x.dtype),
        grid=grid,
        in_specs=[
            pl.BlockSpec((rows, HW), lambda i: (i, 0)),
            pl.BlockSpec((rows, 1), lambda i: (i, 0)),
            pl.BlockSpec((rows, 1), lambda i: (i, 0)),
        ],
        out_specs=pl.BlockSpec((rows, HW), lambda i: (i, 0)),
        compiler_params=pltpu.CompilerParams(
            dimension_semantics=("parallel",)),
    )(x_flat, scale, shift)

    if n_pad != N:
        out_flat = out_flat[:N]
    return out_flat.reshape(B, C, H, W)


def _reference(x, w, weight_proj_w, weight_proj_b, bias_proj_w, bias_proj_b,
               eps=1e-5):
    """Pure-JAX reference mirroring the PyTorch forward (training=True)."""
    B, C, H, W = x.shape
    scale = (w @ weight_proj_w.T + weight_proj_b) + 1.0         # (B, C)
    shift = w @ bias_proj_w.T + bias_proj_b                     # (B, C)
    xf = x.reshape(B, C, H * W)
    mean = xf.mean(axis=-1, keepdims=True)
    var = ((xf - mean) ** 2).mean(axis=-1, keepdims=True)
    out = (xf - mean) / jnp.sqrt(var + eps) * scale[:, :, None] \
        + shift[:, :, None]
    return out.reshape(B, C, H, W)


if __name__ == "__main__":
    B, C, H, W = 2, 4, 16, 16
    NUM_W = 512
    key = jax.random.PRNGKey(0)
    k1, k2, k3, k4, k5, k6 = jax.random.split(key, 6)

    x = jax.random.normal(k1, (B, C, H, W), dtype=jnp.float32)
    w = jax.random.normal(k2, (B, NUM_W), dtype=jnp.float32)

    # Deterministic synthetic parameters (nn.Linear(num_w, num_features) shapes)
    bound = 1.0 / (NUM_W ** 0.5)
    weight_proj_w = jax.random.uniform(k3, (C, NUM_W), jnp.float32, -bound, bound)
    weight_proj_b = jax.random.uniform(k4, (C,), jnp.float32, -bound, bound)
    bias_proj_w = jax.random.uniform(k5, (C, NUM_W), jnp.float32, -bound, bound)
    bias_proj_b = jax.random.uniform(k6, (C,), jnp.float32, -bound, bound)

    out = adaptive_instance_norm2d(x, w, weight_proj_w, weight_proj_b,
                                   bias_proj_w, bias_proj_b)
    out = jax.block_until_ready(out)

    ref = _reference(x, w, weight_proj_w, weight_proj_b,
                     bias_proj_w, bias_proj_b)
    assert out.shape == (B, C, H, W)
    assert jnp.allclose(out, ref, rtol=1e-4, atol=1e-4), "mismatch vs reference"

    print("KERNEL_OK")
</pallas_src>

<mosaic_0001>
module attributes {stable_mosaic.version = 11 : i64} {
  func.func @_adain_kernel(%arg0: i32, %arg1: memref<8x256xf32, #tpu.memory_space<vmem>>, %arg2: memref<8x1xf32, #tpu.memory_space<vmem>>, %arg3: memref<8x1xf32, #tpu.memory_space<vmem>>, %arg4: memref<8x256xf32, #tpu.memory_space<vmem>>) attributes {dimension_semantics = [#tpu.dimension_semantics<parallel>], iteration_bounds = array<i64: 1>, scalar_prefetch = 0 : i64, scratch_operands = 0 : i64, tpu.core_type = #tpu.core_type<tc>, window_params = [{transform_indices = @transform_0, window_bounds = array<i64: 8, 256>}, {transform_indices = @transform_1, window_bounds = array<i64: 8, 1>}, {transform_indices = @transform_2, window_bounds = array<i64: 8, 1>}, {transform_indices = @transform_3, window_bounds = array<i64: 8, 256>}]} {
    %c0 = arith.constant 0 : index
    %c0_0 = arith.constant 0 : index
    %0 = vector.load %arg1[%c0, %c0_0] : memref<8x256xf32, #tpu.memory_space<vmem>>, vector<8x256xf32>
    %cst = arith.constant dense<0.000000e+00> : vector<8xf32>
    %1 = vector.multi_reduction <add>, %0, %cst [1] : vector<8x256xf32> to vector<8xf32>
    %2 = vector.shape_cast %1 : vector<8xf32> to vector<8x1xf32>
    %3 = arith.mulf %0, %0 : vector<8x256xf32>
    %cst_1 = arith.constant dense<0.000000e+00> : vector<8xf32>
    %4 = vector.multi_reduction <add>, %3, %cst_1 [1] : vector<8x256xf32> to vector<8xf32>
    %5 = vector.shape_cast %4 : vector<8xf32> to vector<8x1xf32>
    %cst_2 = arith.constant 3.906250e-03 : f32
    %6 = vector.broadcast %cst_2 : f32 to vector<8x1xf32>
    %7 = arith.mulf %2, %6 : vector<8x1xf32>
    %cst_3 = arith.constant 3.906250e-03 : f32
    %8 = vector.broadcast %cst_3 : f32 to vector<8x1xf32>
    %9 = arith.mulf %5, %8 : vector<8x1xf32>
    %10 = arith.mulf %7, %7 : vector<8x1xf32>
    %11 = arith.subf %9, %10 : vector<8x1xf32>
    %cst_4 = arith.constant 9.99999974E-6 : f32
    %12 = vector.broadcast %cst_4 : f32 to vector<8x1xf32>
    %13 = arith.addf %11, %12 : vector<8x1xf32>
    %14 = math.rsqrt %13 : vector<8x1xf32>
    %c0_5 = arith.constant 0 : index
    %c0_6 = arith.constant 0 : index
    %15 = vector.load %arg2[%c0_5, %c0_6] : memref<8x1xf32, #tpu.memory_space<vmem>>, vector<8x1xf32>
    %16 = arith.mulf %14, %15 : vector<8x1xf32>
    %c0_7 = arith.constant 0 : index
    %c0_8 = arith.constant 0 : index
    %17 = vector.load %arg3[%c0_7, %c0_8] : memref<8x1xf32, #tpu.memory_space<vmem>>, vector<8x1xf32>
    %18 = arith.mulf %7, %16 : vector<8x1xf32>
    %19 = arith.subf %17, %18 : vector<8x1xf32>
    %20 = vector.broadcast %16 : vector<8x1xf32> to vector<8x256xf32>
    %21 = arith.mulf %0, %20 : vector<8x256xf32>
    %22 = vector.broadcast %19 : vector<8x1xf32> to vector<8x256xf32>
    %23 = arith.addf %21, %22 : vector<8x256xf32>
    %c0_9 = arith.constant 0 : index
    %c0_10 = arith.constant 0 : index
    %24 = vector.load %arg4[%c0_9, %c0_10] : memref<8x256xf32, #tpu.memory_space<vmem>>, vector<8x256xf32>
    tpu.vector_store %arg4[%c0_9, %c0_10], %23 {strides = array<i32>} : memref<8x256xf32, #tpu.memory_space<vmem>>, vector<8x256xf32>,
    return
  }
  func.func @transform_0(%arg0: i32) -> (i32, i32) {
    %c0_i32 = arith.constant 0 : i32
    %c0_i32_0 = arith.constant 0 : i32
    return %arg0, %c0_i32 : i32, i32
  }
  func.func @transform_1(%arg0: i32) -> (i32, i32) {
    %c0_i32 = arith.constant 0 : i32
    %c0_i32_0 = arith.constant 0 : i32
    return %arg0, %c0_i32 : i32, i32
  }
  func.func @transform_2(%arg0: i32) -> (i32, i32) {
    %c0_i32 = arith.constant 0 : i32
    %c0_i32_0 = arith.constant 0 : i32
    return %arg0, %c0_i32 : i32, i32
  }
  func.func @transform_3(%arg0: i32) -> (i32, i32) {
    %c0_i32 = arith.constant 0 : i32
    %c0_i32_0 = arith.constant 0 : i32
    return %arg0, %c0_i32 : i32, i32
  }
}

</mosaic_0001>

<bundles_post_ra>
// kernel: tpu_custom_call.1
= control target key start
LH: loop header
LB: loop body
LE: loop exit
PB: predicated region body
PF: predicated region fallthrough
CT: control target
= control target key end

     0   :  { %s146_s0 = inlined_call_operand.vmem [shape: f32[8,256], index: 0, kind: input, shape index: {}]   ;;  %s147_s1 = inlined_call_operand.vmem [shape: f32[8,1], index: 1, kind: input, shape index: {}]   ;;  %s148_s2 = inlined_call_operand.vmem [shape: f32[8,1], index: 2, kind: input, shape index: {}]   ;;  %s149_s3 = inlined_call_operand.hbm [shape: f32[8,256], index: 3, kind: output, shape index: {}]  }
   0x1   :  { %v15_v0 = vld [vmem:[%s146_s0] sm:$0xff]  ;;  %v16_v1 = vld [vmem:[%s146_s0 + $0x8] sm:$0xff] }
   0x2   :  { %8 = vsyncpa [#allocation3], 0  ;;  %v17_v2 = vadd.f32 %v16_v1, %v15_v0  ;;  %v20_v3 = vmul.f32 %v15_v0, %v15_v0  ;;  %v21_v4 = vmul.f32 %v16_v1, %v16_v1  ;;  %v109_v6 = vmov 0   ;;  %v40_v20 = vld [vmem:[%s147_s1] sm:$0xff]  ;;  %s110_s19 = smov [#allocation2]   ;;  %s68_s1 = sshll.u32 %s149_s3, 4  ;;  %s69_s1 = int_to_ptr.hbm [resolvable:$true] %s68_s1 }
   0x3   :  { %79 = vset.pattern.permute.xlu1 %v109_v6  ;;  %80 = vset.pattern.permute.xlu0 %v109_v6  ;;  %v42_v24 = vld [vmem:[%s148_s2] sm:$0xff]  ;;  %s66_s20 = sshll.u32 %s110_s19, 4  ;;  %s67_s20 = int_to_ptr.vmem [resolvable:$true] %s66_s20 }
   0x4   :  { %18 = vadd.xlane.f32.xlu0 %v17_v2  ;;  %v22_v5 = vadd.f32 %v21_v4, %v20_v3 }
   0xc   :  { %23 = vadd.xlane.f32.xlu0 %v22_v5 }
  0x77   :  { %v19_v7 = vpop.xlane.xlu0 %18 }
  0x78   :  { %v25_v8 = vmul.f32 0.00390625, %v19_v7 }
  0x7a   :  { %v27_v10 = vmul.f32 %v25_v8, %v25_v8 }
  0x7f   :  { %v24_v9 = vpop.xlane.xlu0 %23 }
  0x80   :  { %v26_v11 = vmul.f32 0.00390625, %v24_v9 }
  0x82   :  { %v28_v12 = vsub.f32 %v26_v11, %v27_v10 }
  0x84   :  { %v29_v13 = vadd.f32 1e-05, %v28_v12 }
  0x86   :  { %81 = vrsqrt.f32 %v29_v13  ;;  %vm36_vm1 = vweird.f32 %v29_v13 }
  0x8c   :  { %v82_v14 = vpop.eup %81 }
  0x8d   :  { %v31_v15 = vmul.f32 %v82_v14, %v29_v13  ;;  %vm37_vm0 = vweird.f32 %v82_v14 }
  0x8e   :  { %vm38_vm2 = vmor %vm36_vm1, %vm37_vm0 }
  0x8f   :  { %v32_v16 = vmul.f32 %v82_v14, %v31_v15 }
  0x91   :  { %v33_v17 = vmul.f32 0.5, %v32_v16 }
  0x93   :  { %v34_v18 = vsub.f32 1.5, %v33_v17 }
  0x95   :  { %v35_v19 = vmul.f32 %v82_v14, %v34_v18 }
  0x97   :  { %v39_v21 = vsel %vm38_vm2, %v82_v14, %v35_v19 }
  0x98   :  { %v41_v22 = vmul.f32 %v40_v20, %v39_v21 }
  0x9a   :  { %47 = vperm.xlu1 %79, %v41_v22   ;;  %v43_v23 = vmul.f32 %v41_v22, %v25_v8 }
  0x9c   :  { %v44_v25 = vsub.f32 %v42_v24, %v43_v23 }
  0xa2   :  { %54 = vperm.xlu1 %79, %v44_v25  }
 0x10c   :  { %v48_v26 = vpop.permute.xlu1 %47 }
 0x10d   :  { %v50_v27 = vmul.f32 %v48_v26, %v15_v0  ;;  %v51_v28 = vmul.f32 %v48_v26, %v16_v1 }
 0x114   :  { %v55_v29 = vpop.permute.xlu1 %54 }
 0x115   :  { %v57_v30 = vadd.f32 %v55_v29, %v50_v27  ;;  %v58_v31 = vadd.f32 %v55_v29, %v51_v28 }
 0x117   :  { %59 = vst [vmem:[#allocation2] sm:$0xff] %v57_v30 }
 0x118   :  { %60 = vst [vmem:[#allocation2 + $0x8] sm:$0xff] %v58_v31 }
 0x119   :  { %71 = dma.vmem_to_hbm [thread:$0]  %s67_s20, 256, %s69_s1, [#allocation3]  }
 0x11a   :  { %107 = dma.done.wait [#allocation3], 256  }
 0x11b   :  { %108 = vsyncadd [#allocation3], 4294967040 }
 0x11c   :  { %76 = vsyncpa [#allocation3], 1 }

</bundles_post_ra>
